<compile_context>
chip_gen: v6e
topology: v6e:2x2x1
jax: 0.10.0
libtpu: 0.0.40
codegen_flags: <defaults>
</compile_context>

<pallas_src>
import functools
import math

import jax
import jax.numpy as jnp
from jax import lax
from jax.experimental import pallas as pl
from jax.experimental.pallas import tpu as pltpu

LEAK = 0.01
BN_EPS = 1e-5
A_PAD = 128                 # lane-dense padded output width
DEFAULT_BATCH_TILE = 512    # rows per grid step (sized for v7x's 64 MiB VMEM)


def _round_up(x, m):
    return (x + m - 1) // m * m


def _leaky_relu(x, leak=LEAK):
    return jnp.where(x > 0, x, leak * x)


# ---------------------------------------------------------------------------
# Pass 1: full-batch BN statistics (one fused pass: sum(x) and sum(x*x)).
# Outputs are resident accumulators across the batch grid axis ("arbitrary").
# ---------------------------------------------------------------------------
def bn_stats_kernel(x_ref, sum_ref, sumsq_ref):
    @pl.when(pl.program_id(0) == 0)
    def _():
        sum_ref[...] = jnp.zeros_like(sum_ref)
        sumsq_ref[...] = jnp.zeros_like(sumsq_ref)

    x = x_ref[...]
    sum_ref[...] += jnp.sum(x, axis=0, keepdims=True)
    sumsq_ref[...] += jnp.sum(x * x, axis=0, keepdims=True)


# ---------------------------------------------------------------------------
# Pass 2: BN-normalize + fc1/fc2/fc3 on a batch tile.
# ---------------------------------------------------------------------------
def actor_kernel(
    x_ref,      # (TB, S)      f32 states (streamed tile)
    sum_ref,    # (1, S)       f32 full-batch sum(x)
    sumsq_ref,  # (1, S)       f32 full-batch sum(x*x)
    gamma_ref,  # (1, S)       f32 BN weight
    beta_ref,   # (1, S)       f32 BN bias
    w1_ref,     # (S, F1)      bf16 fc1 weight (pre-transposed)
    b1_ref,     # (1, F1)      f32
    w2_ref,     # (F1, F2)     bf16 fc2 weight (pre-transposed)
    b2_ref,     # (1, F2)      f32
    w3_ref,     # (F2, A_PAD)  bf16 fc3 weight (pre-transposed, lane-padded)
    b3_ref,     # (1, A_PAD)   f32 (lane-padded)
    o_ref,      # (TB, A_PAD)  f32 output
    *,
    inv_count,  # static 1 / real_batch_size
):
    # --- BatchNorm1d (training-mode stats over the FULL batch, f32 on VPU) ---
    mean = sum_ref[...] * inv_count
    var = sumsq_ref[...] * inv_count - mean * mean
    scale = gamma_ref[...] * lax.rsqrt(var + BN_EPS)
    shift = beta_ref[...] - mean * scale
    xn = x_ref[...] * scale + shift

    # --- fc1 + leaky_relu (bf16 MXU, f32 accumulate; K=32 underfills MXU —
    #     expected, per review fc1 can never be MXU-efficient) ---
    h1 = jnp.dot(xn.astype(jnp.bfloat16), w1_ref[...],
                 preferred_element_type=jnp.float32) + b1_ref[...]
    h1 = _leaky_relu(h1)

    # --- fc2 + leaky_relu ---
    h2 = jnp.dot(h1.astype(jnp.bfloat16), w2_ref[...],
                 preferred_element_type=jnp.float32) + b2_ref[...]
    h2 = _leaky_relu(h2)

    # --- fc3 + tanh (lane-dense padded head; extra columns sliced in wrapper) ---
    h3 = jnp.dot(h2.astype(jnp.bfloat16), w3_ref[...],
                 preferred_element_type=jnp.float32) + b3_ref[...]
    o_ref[...] = jnp.tanh(h3)


def actor_forward(state, params, *, batch_tile=DEFAULT_BATCH_TILE):
    """Actor forward pass. Handles any batch size by zero-padding rows."""
    B, S = state.shape
    A = params["action_size"]
    F1 = params["w1t"].shape[1]
    F2 = params["w2t"].shape[1]

    tb = min(batch_tile, _round_up(B, 8))
    b_pad = _round_up(B, tb)
    if b_pad != B:
        # Zero rows contribute nothing to sum / sum-of-squares, so BN stats
        # (divided by the real B) remain exact.
        state = jnp.pad(state, ((0, b_pad - B), (0, 0)))
    n_tiles = b_pad // tb

    # ---- pass 1: full-batch BN statistics (never computed per tile) ----
    sum_x, sumsq_x = pl.pallas_call(
        bn_stats_kernel,
        grid=(n_tiles,),
        in_specs=[pl.BlockSpec((tb, S), lambda i: (i, 0))],
        out_specs=[pl.BlockSpec((1, S), lambda i: (0, 0)),
                   pl.BlockSpec((1, S), lambda i: (0, 0))],
        out_shape=[jax.ShapeDtypeStruct((1, S), jnp.float32),
                   jax.ShapeDtypeStruct((1, S), jnp.float32)],
        compiler_params=pltpu.CompilerParams(
            dimension_semantics=("arbitrary",)),
    )(state)

    # ---- pass 2: normalize + MLP; weights resident, batch tiles streamed ----
    resident = lambda i: (0, 0)
    kernel = functools.partial(actor_kernel, inv_count=1.0 / B)
    out = pl.pallas_call(
        kernel,
        grid=(n_tiles,),
        in_specs=[
            pl.BlockSpec((tb, S), lambda i: (i, 0)),   # states stream
            pl.BlockSpec((1, S), resident),            # sum(x)
            pl.BlockSpec((1, S), resident),            # sum(x*x)
            pl.BlockSpec((1, S), resident),            # gamma
            pl.BlockSpec((1, S), resident),            # beta
            pl.BlockSpec((S, F1), resident),           # w1t (bf16)
            pl.BlockSpec((1, F1), resident),           # b1
            pl.BlockSpec((F1, F2), resident),          # w2t (bf16)
            pl.BlockSpec((1, F2), resident),           # b2
            pl.BlockSpec((F2, A_PAD), resident),       # w3t (bf16, lane-padded)
            pl.BlockSpec((1, A_PAD), resident),        # b3 (lane-padded)
        ],
        out_specs=pl.BlockSpec((tb, A_PAD), lambda i: (i, 0)),
        out_shape=jax.ShapeDtypeStruct((b_pad, A_PAD), jnp.float32),
        compiler_params=pltpu.CompilerParams(
            dimension_semantics=("parallel",),          # 2-TC sharding on v7x
            vmem_limit_bytes=32 * 1024 * 1024),
    )(state, sum_x, sumsq_x,
      params["gamma"], params["beta"],
      params["w1t"], params["b1"],
      params["w2t"], params["b2"],
      params["w3t_pad"], params["b3_pad"])

    return out[:B, :A]


def init_actor_params(key, state_size, action_size, fc1=256, fc2=128, leak=LEAK):
    """Deterministic init mirroring Actor.__init__ / reset_parameters."""
    ks = jax.random.split(key, 6)

    def kaiming_normal(k, fan_in, fan_out, a):
        std = math.sqrt(2.0 / (1.0 + a * a)) / math.sqrt(fan_in)
        return std * jax.random.normal(k, (fan_out, fan_in), jnp.float32)

    def linear_bias(k, fan_in, fan_out):
        bound = 1.0 / math.sqrt(fan_in)
        return jax.random.uniform(k, (fan_out,), jnp.float32, -bound, bound)

    w1 = kaiming_normal(ks[0], state_size, fc1, leak)
    w2 = kaiming_normal(ks[1], fc1, fc2, leak)
    w3 = jax.random.uniform(ks[2], (action_size, fc2), jnp.float32, -0.003, 0.003)
    b1 = linear_bias(ks[3], state_size, fc1)
    b2 = linear_bias(ks[4], fc1, fc2)
    b3 = linear_bias(ks[5], fc2, action_size)

    # bf16 pre-transposed (in, out) weights for the MXU; f32 everything else.
    w1t = jnp.asarray(w1.T, jnp.bfloat16)
    w2t = jnp.asarray(w2.T, jnp.bfloat16)
    w3t = jnp.asarray(w3.T, jnp.bfloat16)

    # Lane-dense padding of the small action head (A -> A_PAD output columns).
    w3t_pad = jnp.zeros((fc2, A_PAD), jnp.bfloat16).at[:, :action_size].set(w3t)
    b3_pad = jnp.zeros((1, A_PAD), jnp.float32).at[0, :action_size].set(b3)

    return {
        "action_size": action_size,
        "w1t": w1t, "b1": b1.reshape(1, -1),
        "w2t": w2t, "b2": b2.reshape(1, -1),
        "w3t_pad": w3t_pad, "b3_pad": b3_pad,
        # BatchNorm1d affine params (default init: gamma=1, beta=0)
        "gamma": jnp.ones((1, state_size), jnp.float32),
        "beta": jnp.zeros((1, state_size), jnp.float32),
        # unpadded copies for the pure-JAX reference
        "w3t": w3t, "b3": b3.reshape(1, -1),
    }


def actor_reference(state, params):
    """Pure-JAX f32 reference (uses the same bf16-rounded weights)."""
    mean = jnp.mean(state, axis=0, keepdims=True)
    var = jnp.mean((state - mean) ** 2, axis=0, keepdims=True)
    xn = (state - mean) * lax.rsqrt(var + BN_EPS) * params["gamma"] + params["beta"]
    h1 = _leaky_relu(xn @ params["w1t"].astype(jnp.float32) + params["b1"])
    h2 = _leaky_relu(h1 @ params["w2t"].astype(jnp.float32) + params["b2"])
    return jnp.tanh(h2 @ params["w3t"].astype(jnp.float32) + params["b3"])


if __name__ == "__main__":
    key = jax.random.PRNGKey(0)
    k_param, k_state = jax.random.split(key)

    # Small demo shapes; the same wrapper scales to large B (batch-tiled grid).
    B, STATE_SIZE, ACTION_SIZE = 8, 32, 4
    params = init_actor_params(k_param, STATE_SIZE, ACTION_SIZE)
    state = jax.random.normal(k_state, (B, STATE_SIZE), jnp.float32)

    # TODO(synk): PyTorch BatchNorm1d raises for B=1 in training mode; here it
    # is numerically defined (var=0 -> 1/sqrt(eps)) instead.
    out = jax.block_until_ready(actor_forward(state, params))
    ref = actor_reference(state, params)

    assert out.shape == (B, ACTION_SIZE)
    assert bool(jnp.all(jnp.isfinite(out)))
    # bf16 activations on the MXU -> tolerance looser than the pure-f32 check.
    assert jnp.allclose(out, ref, atol=2e-2, rtol=0.0), "mismatch vs reference"

    print("KERNEL_OK")
</pallas_src>

<mosaic_0001>
module attributes {stable_mosaic.version = 11 : i64} {
  func.func @bn_stats_kernel(%arg0: i32, %arg1: memref<8x32xf32, #tpu.memory_space<vmem>>, %arg2: memref<1x32xf32, #tpu.memory_space<vmem>>, %arg3: memref<1x32xf32, #tpu.memory_space<vmem>>) attributes {dimension_semantics = [#tpu.dimension_semantics<arbitrary>], iteration_bounds = array<i64: 1>, scalar_prefetch = 0 : i64, scratch_operands = 0 : i64, tpu.core_type = #tpu.core_type<tc>, window_params = [{transform_indices = @transform_0, window_bounds = array<i64: 8, 32>}, {pipeline_mode = #tpu.pipeline_mode<synchronous>, transform_indices = @transform_1, window_bounds = array<i64: 1, 32>}, {pipeline_mode = #tpu.pipeline_mode<synchronous>, transform_indices = @transform_2, window_bounds = array<i64: 1, 32>}]} {
    %c0_i32 = arith.constant 0 : i32
    %0 = arith.cmpi eq, %arg0, %c0_i32 : i32
    %1 = arith.extui %0 : i1 to i32
    %c0_i32_0 = arith.constant 0 : i32
    %2 = arith.cmpi ne, %1, %c0_i32_0 : i32
    scf.if %2 {
      %cst_11 = arith.constant 0.000000e+00 : f32
      %15 = vector.broadcast %cst_11 : f32 to vector<1x32xf32>
      %c0_12 = arith.constant 0 : index
      %c0_13 = arith.constant 0 : index
      %16 = vector.load %arg2[%c0_12, %c0_13] : memref<1x32xf32, #tpu.memory_space<vmem>>, vector<1x32xf32>
      tpu.vector_store %arg2[%c0_12, %c0_13], %15 {strides = array<i32>} : memref<1x32xf32, #tpu.memory_space<vmem>>, vector<1x32xf32>,
      %cst_14 = arith.constant 0.000000e+00 : f32
      %17 = vector.broadcast %cst_14 : f32 to vector<1x32xf32>
      %c0_15 = arith.constant 0 : index
      %c0_16 = arith.constant 0 : index
      %18 = vector.load %arg3[%c0_15, %c0_16] : memref<1x32xf32, #tpu.memory_space<vmem>>, vector<1x32xf32>
      tpu.vector_store %arg3[%c0_15, %c0_16], %17 {strides = array<i32>} : memref<1x32xf32, #tpu.memory_space<vmem>>, vector<1x32xf32>,
    } else {
    }
    %c0 = arith.constant 0 : index
    %c0_1 = arith.constant 0 : index
    %3 = vector.load %arg1[%c0, %c0_1] : memref<8x32xf32, #tpu.memory_space<vmem>>, vector<8x32xf32>
    %c0_2 = arith.constant 0 : index
    %c0_3 = arith.constant 0 : index
    %4 = vector.load %arg2[%c0_2, %c0_3] : memref<1x32xf32, #tpu.memory_space<vmem>>, vector<1x32xf32>
    %cst = arith.constant dense<0.000000e+00> : vector<32xf32>
    %5 = vector.multi_reduction <add>, %3, %cst [0] : vector<8x32xf32> to vector<32xf32>
    %6 = vector.shape_cast %5 : vector<32xf32> to vector<1x32xf32>
    %7 = arith.addf %4, %6 : vector<1x32xf32>
    %c0_4 = arith.constant 0 : index
    %c0_5 = arith.constant 0 : index
    %8 = vector.load %arg2[%c0_4, %c0_5] : memref<1x32xf32, #tpu.memory_space<vmem>>, vector<1x32xf32>
    tpu.vector_store %arg2[%c0_4, %c0_5], %7 {strides = array<i32>} : memref<1x32xf32, #tpu.memory_space<vmem>>, vector<1x32xf32>,
    %c0_6 = arith.constant 0 : index
    %c0_7 = arith.constant 0 : index
    %9 = vector.load %arg3[%c0_6, %c0_7] : memref<1x32xf32, #tpu.memory_space<vmem>>, vector<1x32xf32>
    %10 = arith.mulf %3, %3 : vector<8x32xf32>
    %cst_8 = arith.constant dense<0.000000e+00> : vector<32xf32>
    %11 = vector.multi_reduction <add>, %10, %cst_8 [0] : vector<8x32xf32> to vector<32xf32>
    %12 = vector.shape_cast %11 : vector<32xf32> to vector<1x32xf32>
    %13 = arith.addf %9, %12 : vector<1x32xf32>
    %c0_9 = arith.constant 0 : index
    %c0_10 = arith.constant 0 : index
    %14 = vector.load %arg3[%c0_9, %c0_10] : memref<1x32xf32, #tpu.memory_space<vmem>>, vector<1x32xf32>
    tpu.vector_store %arg3[%c0_9, %c0_10], %13 {strides = array<i32>} : memref<1x32xf32, #tpu.memory_space<vmem>>, vector<1x32xf32>,
    return
  }
  func.func @transform_0(%arg0: i32) -> (i32, i32) {
    %c0_i32 = arith.constant 0 : i32
    %c0_i32_0 = arith.constant 0 : i32
    return %arg0, %c0_i32 : i32, i32
  }
  func.func @transform_1(%arg0: i32) -> (i32, i32) {
    %c0_i32 = arith.constant 0 : i32
    %c0_i32_0 = arith.constant 0 : i32
    %c0_i32_1 = arith.constant 0 : i32
    return %c0_i32, %c0_i32_0 : i32, i32
  }
  func.func @transform_2(%arg0: i32) -> (i32, i32) {
    %c0_i32 = arith.constant 0 : i32
    %c0_i32_0 = arith.constant 0 : i32
    %c0_i32_1 = arith.constant 0 : i32
    return %c0_i32, %c0_i32_0 : i32, i32
  }
}

</mosaic_0001>

<bundles_post_ra>
// kernel: tpu_custom_call.1
= control target key start
LH: loop header
LB: loop body
LE: loop exit
PB: predicated region body
PF: predicated region fallthrough
CT: control target
= control target key end

     0   :  { %8 = vsyncpa [#allocation3], 0  ;;  %s186_s0 = inlined_call_operand.hbm [shape: f32[8,32], index: 0, kind: input, shape index: {}]   ;;  %s187_s1 = inlined_call_operand.hbm [shape: f32[1,32], index: 1, kind: output, shape index: {0}]   ;;  %s188_s2 = inlined_call_operand.hbm [shape: f32[1,32], index: 2, kind: output, shape index: {1}]  }
   0x1   :  { %9 = vsyncpa [#allocation4], 0 }
   0x2   :  { %10 = vsyncpa [#allocation7], 0  ;;  %s154_s9 = smov [#allocation2]  }
   0x3   :  { %s17_s10 = sshll.u32 %s154_s9, 4  ;;  %s18_s10 = int_to_ptr.vmem [resolvable:$true] %s17_s10 }
   0x4   :  { %s96_s11 = scalar_lea.vmem %s18_s10, 128  ;;  %p101_p1 = scmp.lt.s32.totalorder %s18_s10, %s18_s10 }
   0x5   :  { %p97_p0 = scmp.ne.s32.totalorder %s18_s10, %s96_s11  ;;  %p102_p2 = scmp.lt.s32.totalorder %s96_s11, %s96_s11 }
   0x7   :  { %p103_p3 = por %p102_p2, %p101_p1 }
   0x9   :  { %p104_p4 = pnand %p103_p3, %p97_p0 }
   0xb   :  { %107 = shalt.err (!%p104_p4)
}
   0xc   :  { %20 = dma.hbm_to_vmem [thread:$0]  %s186_s0, 128, %s18_s10, [#allocation3]  }
   0xd   :  { %148 = dma.done.wait [#allocation3], 128  }
   0xe   :  { %149 = vsyncadd [#allocation3], 4294967168  ;;  %vm28_vm0 = vcmask 253952   ;;  %v155_v0 = vmov 0.0   ;;  %vm33_vm1 = vcmask 261120   ;;  %v31_v1 = vld [vmem:[#allocation2] sm:$0xff] }
   0xf   :  { %29 = vst.msk [vmem:[#allocation5] sm:$0x1] %vm28_vm0, %v155_v0  ;;  %30 = vst.msk [vmem:[#allocation6] sm:$0x1] %vm28_vm0, %v155_v0  ;;  %v34_v2 = vsel %vm33_vm1, %v31_v1, 0.0  ;;  %v45_v3 = vmul.f32 %v31_v1, %v31_v1  ;;  %s156_s0 = smov [#allocation5]  }
  0x10   :  { %v35_v4 = vrot.slane %v34_v2, 4  ;;  %s61_s14 = sshll.u32 %s156_s0, 4  ;;  %s157_s15 = smov [#allocation6]   ;;  %s62_s14 = int_to_ptr.vmem [resolvable:$true] %s61_s14 }
  0x11   :  { %v46_v5 = vsel %vm33_vm1, %v45_v3, 0.0  ;;  %s71_s16 = sshll.u32 %s157_s15, 4  ;;  %s108_s17 = scalar_lea.vmem %s62_s14, 16  ;;  %s72_s16 = int_to_ptr.vmem [resolvable:$true] %s71_s16 }
  0x12   :  { %v36_v6 = vadd.f32 %v35_v4, %v34_v2  ;;  %v47_v7 = vrot.slane %v46_v5, 4  ;;  %p109_p5 = scmp.ne.s32.totalorder %s62_s14, %s108_s17  ;;  %s112_s18 = scalar_lea.vmem %s62_s14, 32 }
  0x13   :  { %p113_p6 = scmp.lt.s32.totalorder %s62_s14, %s62_s14  ;;  %p114_p7 = scmp.lt.s32.totalorder %s112_s18, %s108_s17 }
  0x14   :  { %v37_v8 = vrot.slane %v36_v6, 2  ;;  %v48_v9 = vadd.f32 %v47_v7, %v46_v5 }
  0x15   :  { %p115_p8 = por %p114_p7, %p113_p6 }
  0x16   :  { %v38_v10 = vadd.f32 %v37_v8, %v36_v6  ;;  %v49_v11 = vrot.slane %v48_v9, 2  ;;  %v32_v14 = vld [vmem:[#allocation5] sm:$0x1]  ;;  %v44_v17 = vld [vmem:[#allocation6] sm:$0x1] }
  0x17   :  { %p116_p9 = pnand %p115_p8, %p109_p5 }
  0x18   :  { %v39_v12 = vrot.slane %v38_v10, 1  ;;  %v50_v13 = vadd.f32 %v49_v11, %v48_v9 }
  0x1a   :  { %v40_v15 = vadd.f32 %v39_v12, %v38_v10  ;;  %v51_v16 = vrot.slane %v50_v13, 1 }
  0x1c   :  { %v41_v18 = vadd.f32 %v40_v15, %v32_v14  ;;  %v52_v19 = vadd.f32 %v51_v16, %v50_v13 }
  0x1e   :  { %43 = vst.msk [vmem:[#allocation5] sm:$0x1] %vm28_vm0, %v41_v18  ;;  %v53_v20 = vadd.f32 %v52_v19, %v44_v17 }
  0x1f   :  { %119 = shalt.err (!%p116_p9)
}
  0x20   :  { %64 = dma.vmem_to_hbm [thread:$0]  %s62_s14, 16, %s187_s1, [#allocation4]   ;;  %54 = vst.msk [vmem:[#allocation6] sm:$0x1] %vm28_vm0, %v53_v20 }
  0x21   :  { %s128_s21 = scalar_lea.vmem %s72_s16, 16  ;;  %s132_s22 = scalar_lea.vmem %s72_s16, 32 }
  0x22   :  { %p129_p10 = scmp.ne.s32.totalorder %s72_s16, %s128_s21  ;;  %p133_p11 = scmp.lt.s32.totalorder %s72_s16, %s72_s16 }
  0x23   :  { %p134_p12 = scmp.lt.s32.totalorder %s132_s22, %s128_s21 }
  0x25   :  { %p135_p13 = por %p134_p12, %p133_p11 }
  0x27   :  { %p136_p0 = pnand %p135_p13, %p129_p10 }
  0x29   :  { %139 = shalt.err (!%p136_p0)
}
  0x2a   :  { %74 = dma.vmem_to_hbm [thread:$0]  %s72_s16, 16, %s188_s2, [#allocation7]  }
  0x2b   :  { %150 = dma.done.wait [#allocation4], 16  }
  0x2c   :  { %151 = vsyncadd [#allocation4], 4294967280 }
  0x2d   :  { %152 = dma.done.wait [#allocation7], 16  }
  0x2e   :  { %153 = vsyncadd [#allocation7], 4294967280 }
  0x2f   :  { %81 = vsyncpa [#allocation3], 1 }
  0x30   :  { %82 = vsyncpa [#allocation4], 1 }
  0x31   :  { %83 = vsyncpa [#allocation7], 1 }

</bundles_post_ra>
